<compile_context>
chip_gen: v6e
topology: v6e:2x2x1
jax: 0.10.0
libtpu: 0.0.40
codegen_flags: <defaults>
</compile_context>

<pallas_src>
import functools
import math

import jax
import jax.numpy as jnp
from jax.experimental import pallas as pl
from jax.experimental.pallas import tpu as pltpu


def _ceil_to(x, m):
    return ((x + m - 1) // m) * m


# ---------------------------------------------------------------------------
# Kernel 1: tiled (1, N) @ (N, N) matvec, int8 HBM stream, f32 MXU accumulation
# ---------------------------------------------------------------------------
def _score_matvec_kernel(v_ref, a_ref, o_ref):
    k = pl.program_id(1)

    @pl.when(k == 0)
    def _init():
        o_ref[...] = jnp.zeros_like(o_ref)

    # int8 tile from HBM (halves the dominant N^2 DMA); VPU upcast is overlapped
    # filler, dot accumulates directly into the resident f32 output block.
    o_ref[...] += jnp.dot(v_ref[...], a_ref[...].astype(jnp.float32),
                          preferred_element_type=jnp.float32)


def _score_matvec(v_row, a_t, tile):
    """raw[0, i] = sum_j v_row[0, j] * a_t[j, i]   (lane-dense (1, N) output)."""
    n_pad = a_t.shape[0]
    grid = (n_pad // tile, n_pad // tile)          # (j: output cols, k: reduction)
    return pl.pallas_call(
        _score_matvec_kernel,
        grid_spec=pltpu.PrefetchScalarGridSpec(
            num_scalar_prefetch=0,
            grid=grid,
            in_specs=[
                pl.BlockSpec((1, tile), lambda j, k: (0, k)),       # v chunk (f32)
                pl.BlockSpec((tile, tile), lambda j, k: (k, j)),    # A_T tile (int8)
            ],
            out_specs=pl.BlockSpec((1, tile), lambda j, k: (0, j)),
        ),
        out_shape=jax.ShapeDtypeStruct((1, n_pad), jnp.float32),
        compiler_params=pltpu.CompilerParams(
            dimension_semantics=("parallel", "arbitrary"),
            vmem_limit_bytes=32 * 1024 * 1024,
        ),
        cost_estimate=pl.CostEstimate(
            flops=2 * n_pad * n_pad,
            transcendentals=0,
            bytes_accessed=n_pad * n_pad * 1 + n_pad * 4 + n_pad * 4,
        ),
    )(v_row, a_t)


def gcn_score(x, w, b, edge_index, num_nodes, *, tile=1024):
    """GCNConv(in_channels, 1) scores for a single graph, returns (N,) f32."""
    n = num_nodes
    src = edge_index[0].astype(jnp.int32)
    dst = edge_index[1].astype(jnp.int32)

    n_pad = _ceil_to(n, 128)
    t = min(tile, n_pad)
    n_pad = _ceil_to(n_pad, t)

    # add_remaining_self_loops semantics: keep existing self loops, add one only
    # for nodes that do not already have one.
    is_loop = (src == dst)
    has_loop = jnp.zeros((n,), jnp.int32).at[src].add(is_loop.astype(jnp.int32)) > 0
    add_loop = jnp.logical_not(has_loop)
    diag = jnp.arange(n, dtype=jnp.int32)

    # Raw transposed adjacency counts A_T[src, dst] built *directly* in int8
    # (no f32 N^2 intermediate, no extra cast pass over N^2 bytes).
    # TODO(synk): >127 duplicate parallel edges between one node pair would
    # overflow int8 counts; for E << N^2 a scalar-prefetch CSR SpMV would avoid
    # the dense N^2 matrix entirely (dense path kept for GCNConv-equivalent layout).
    a_t = jnp.zeros((n_pad, n_pad), jnp.int8)
    a_t = a_t.at[src, dst].add(jnp.ones_like(src, dtype=jnp.int8))
    a_t = a_t.at[diag, diag].add(add_loop.astype(jnp.int8))

    # In-degree (incl. self loops) straight from the edge list — no N^2 pass.
    deg = jnp.zeros((n,), jnp.float32).at[dst].add(1.0) + add_loop.astype(jnp.float32)
    dinv = jnp.where(deg > 0, jax.lax.rsqrt(deg), 0.0)

    # xw computed exactly once (N x C @ C x 1, tiny); left D^-1/2 folded in.
    # v stays f32 — negligible bytes, recovers the precision lost to bf16 before.
    xw = jnp.dot(x.astype(jnp.float32), w.astype(jnp.float32))[:, 0]      # (N,)
    v = dinv * xw                                                         # (N,) f32
    v_row = jnp.zeros((1, n_pad), jnp.float32).at[0, :n].set(v)

    raw = _score_matvec(v_row, a_t, t)[0, :n]                             # (N,)
    # Right D^-1/2 scaling + bias are trivial N-vector ops in the wrapper.
    return raw * dinv + b[0]


# ---------------------------------------------------------------------------
# Kernel 2: dense blocked masked max/sum pool of x * gate  (gate=0 off-perm)
# ---------------------------------------------------------------------------
def _masked_pool_kernel(x_ref, gate_ref, mask_ref, o_ref, max_sc, sum_sc, *, inv_k):
    i = pl.program_id(0)

    @pl.when(i == 0)
    def _init():
        max_sc[...] = jnp.full_like(max_sc, -jnp.inf)
        sum_sc[...] = jnp.zeros_like(sum_sc)

    gated = x_ref[...].astype(jnp.float32) * gate_ref[...]           # (R, Cp)
    masked = jnp.where(mask_ref[...] > 0.0, gated, -jnp.inf)         # -inf off-perm
    max_sc[...] = jnp.maximum(max_sc[...], jnp.max(masked, axis=0, keepdims=True))
    sum_sc[...] = sum_sc[...] + jnp.sum(gated, axis=0, keepdims=True)

    @pl.when(i == pl.num_programs(0) - 1)
    def _done():
        # Single lane-dense (1, 2*Cp) store: [global-max | global-mean].
        o_ref[...] = jnp.concatenate([max_sc[...], sum_sc[...] * inv_k], axis=1)


def gate_and_pool(x, score, perm, *, rows=512):
    """cat([gmp, gap], dim=1) of x[perm] * tanh(score[perm]) — [1, 2C]."""
    n, c = x.shape
    k = int(perm.shape[0])
    c_pad = _ceil_to(c, 128)
    n_pad = _ceil_to(n, 8)
    r = min(rows, n_pad)
    n_pad = _ceil_to(n_pad, r)

    if (n_pad, c_pad) != (n, c):
        x_p = jnp.zeros((n_pad, c_pad), x.dtype).at[:n, :c].set(x)
    else:
        x_p = x

    # Per-row gate (tanh(score), zero off-perm / on padding) and selection mask.
    sel = jnp.zeros((n_pad,), jnp.bool_).at[perm].set(True)
    score_p = jnp.zeros((n_pad,), jnp.float32).at[:n].set(score.astype(jnp.float32))
    gate = jnp.where(sel, jnp.tanh(score_p), 0.0).reshape(n_pad, 1)
    mask = sel.astype(jnp.float32).reshape(n_pad, 1)

    kern = functools.partial(_masked_pool_kernel, inv_k=1.0 / k)
    # TODO(synk): on v7x a leading size-2 'parallel' axis with per-core partials
    # would split this reduction across both TensorCores for very large N.
    out = pl.pallas_call(
        kern,
        grid_spec=pltpu.PrefetchScalarGridSpec(
            num_scalar_prefetch=0,
            grid=(n_pad // r,),
            in_specs=[
                pl.BlockSpec((r, c_pad), lambda i: (i, 0)),   # contiguous x rows
                pl.BlockSpec((r, 1), lambda i: (i, 0)),       # per-row gate
                pl.BlockSpec((r, 1), lambda i: (i, 0)),       # per-row mask
            ],
            out_specs=pl.BlockSpec((1, 2 * c_pad), lambda i: (0, 0)),
            scratch_shapes=[pltpu.VMEM((1, c_pad), jnp.float32),
                            pltpu.VMEM((1, c_pad), jnp.float32)],
        ),
        out_shape=jax.ShapeDtypeStruct((1, 2 * c_pad), jnp.float32),
        compiler_params=pltpu.CompilerParams(
            dimension_semantics=("arbitrary",),
            vmem_limit_bytes=32 * 1024 * 1024,
        ),
        cost_estimate=pl.CostEstimate(
            flops=4 * n_pad * c_pad,
            transcendentals=0,
            bytes_accessed=(n_pad * c_pad * x.dtype.itemsize
                            + 2 * n_pad * 4 + 2 * c_pad * 4),
        ),
    )(x_p, gate, mask)

    # Tiny (1, 2C) slice/concat — kernel store path itself is unmasked/lane-dense.
    return jnp.concatenate([out[:, :c], out[:, c_pad:c_pad + c]], axis=1)


# ---------------------------------------------------------------------------
# Module wrapper
# ---------------------------------------------------------------------------
class SAGPoolPallas:
    """JAX/Pallas port of SAGPool(in_channels, ratio, Conv=GCNConv, tanh)."""

    def __init__(self, in_channels, ratio=0.8, key=jax.random.PRNGKey(42)):
        self.in_channels = in_channels
        self.ratio = ratio
        # GCNConv(in_channels, 1): weight [C, 1] glorot-uniform, bias [1] zeros.
        limit = math.sqrt(6.0 / (in_channels + 1))
        self.weight = jax.random.uniform(key, (in_channels, 1), jnp.float32,
                                         -limit, limit)
        self.bias = jnp.zeros((1,), jnp.float32)

    def __call__(self, x, edge_index, edge_attr=None, batch=None):
        n = x.shape[0]
        if batch is not None:
            # TODO(synk): general multi-graph `batch` vector (per-graph top-k and
            # segment pooling) not implemented; forward's default batch=None
            # (single graph) path is reproduced exactly.
            raise NotImplementedError("only batch=None (single graph) supported")

        # score = self.score_layer(x, edge_index).squeeze()
        score = gcn_score(x, self.weight, self.bias, edge_index, n)      # (N,)

        # perm = topk(score, ratio, batch)  (single graph, k clamped to N)
        if self.ratio >= 1:
            k = min(int(self.ratio), n)
        else:
            k = int(math.ceil(float(self.ratio) * n))
        k = max(k, 1)
        # TODO(synk): tie-break order on exactly equal scores may differ from torch.topk.
        _, perm = jax.lax.top_k(score, k)                                # descending

        # TODO(synk): filter_adj(edge_index, ...) is computed in the PyTorch
        # forward but its result is not among the returned outputs and has a
        # data-dependent shape; omitted from the kernel path.

        # x = x[perm] * tanh(score[perm]); pooled = [gmp | gap]   (dense masked kernel)
        pooled = gate_and_pool(x, score, perm)                           # (1, 2C)
        return pooled, score


# ---------------------------------------------------------------------------
if __name__ == "__main__":
    key = jax.random.PRNGKey(0)
    kx, ks, ko, kw = jax.random.split(key, 4)

    N, C, E = 20, 32, 64                      # nodes, in_channels, edges
    x = jax.random.normal(kx, (N, C), jnp.float32)
    src = jax.random.randint(ks, (E,), 0, N)
    off = jax.random.randint(ko, (E,), 1, N)
    dst = (src + off) % N                     # guarantees no self loops
    edge_index = jnp.stack([src, dst]).astype(jnp.int32)

    model = SAGPoolPallas(C, ratio=0.8, key=kw)
    pooled, score = model(x, edge_index)
    jax.block_until_ready((pooled, score))

    # --- pure-JAX dense f32 reference (PyG gcn_norm semantics) ---------------
    # (test edges contain no self loops, so unconditional append == add_remaining)
    loop = jnp.arange(N, dtype=jnp.int32)
    src_all = jnp.concatenate([edge_index[0], loop])
    dst_all = jnp.concatenate([edge_index[1], loop])
    a = jnp.zeros((N, N), jnp.float32).at[dst_all, src_all].add(1.0)
    deg = jnp.sum(a, axis=1)
    dinv = jnp.where(deg > 0, jax.lax.rsqrt(deg), 0.0)
    a_hat = dinv[:, None] * a * dinv[None, :]
    score_ref = a_hat @ (x @ model.weight)[:, 0] + model.bias[0]

    k_sel = int(math.ceil(0.8 * N))
    _, perm_ref = jax.lax.top_k(score, k_sel)           # same perm as the model
    gated = x[perm_ref] * jnp.tanh(score[perm_ref])[:, None]
    pooled_ref = jnp.concatenate([gated.max(0, keepdims=True),
                                  gated.mean(0, keepdims=True)], axis=1)

    assert pooled.shape == (1, 2 * C), pooled.shape
    assert score.shape == (N,), score.shape
    assert bool(jnp.all(jnp.isfinite(pooled))) and bool(jnp.all(jnp.isfinite(score)))
    err_s = float(jnp.max(jnp.abs(score - score_ref)))
    err_p = float(jnp.max(jnp.abs(pooled - pooled_ref)))
    assert err_s < 1e-3, f"score mismatch: {err_s}"     # full f32 path now
    assert err_p < 1e-3, f"pooled mismatch: {err_p}"
    print("KERNEL_OK")
</pallas_src>

<mosaic_0001>
module attributes {stable_mosaic.version = 11 : i64} {
  func.func @_score_matvec_kernel(%arg0: i32, %arg1: i32, %arg2: memref<1x128xf32, #tpu.memory_space<vmem>>, %arg3: memref<128x128xi8, #tpu.memory_space<vmem>>, %arg4: memref<1x128xf32, #tpu.memory_space<vmem>>) attributes {dimension_semantics = [#tpu.dimension_semantics<parallel>, #tpu.dimension_semantics<arbitrary>], iteration_bounds = array<i64: 1, 1>, scalar_prefetch = 0 : i64, scratch_operands = 0 : i64, tpu.core_type = #tpu.core_type<tc>, window_params = [{transform_indices = @transform_0, window_bounds = array<i64: 1, 128>}, {transform_indices = @transform_1, window_bounds = array<i64: 128, 128>}, {transform_indices = @transform_2, window_bounds = array<i64: 1, 128>}]} {
    %c0_i32 = arith.constant 0 : i32
    %0 = arith.cmpi eq, %arg1, %c0_i32 : i32
    %1 = arith.extui %0 : i1 to i32
    %c0_i32_0 = arith.constant 0 : i32
    %2 = arith.cmpi ne, %1, %c0_i32_0 : i32
    scf.if %2 {
      %cst_8 = arith.constant 0.000000e+00 : f32
      %10 = vector.broadcast %cst_8 : f32 to vector<1x128xf32>
      %c0_9 = arith.constant 0 : index
      %c0_10 = arith.constant 0 : index
      %11 = vector.load %arg4[%c0_9, %c0_10] : memref<1x128xf32, #tpu.memory_space<vmem>>, vector<1x128xf32>
      tpu.vector_store %arg4[%c0_9, %c0_10], %10 {strides = array<i32>} : memref<1x128xf32, #tpu.memory_space<vmem>>, vector<1x128xf32>,
    } else {
    }
    %c0 = arith.constant 0 : index
    %c0_1 = arith.constant 0 : index
    %3 = vector.load %arg4[%c0, %c0_1] : memref<1x128xf32, #tpu.memory_space<vmem>>, vector<1x128xf32>
    %c0_2 = arith.constant 0 : index
    %c0_3 = arith.constant 0 : index
    %4 = vector.load %arg2[%c0_2, %c0_3] : memref<1x128xf32, #tpu.memory_space<vmem>>, vector<1x128xf32>
    %c0_4 = arith.constant 0 : index
    %c0_5 = arith.constant 0 : index
    %5 = vector.load %arg3[%c0_4, %c0_5] : memref<128x128xi8, #tpu.memory_space<vmem>>, vector<128x128xi8>
    %6 = arith.sitofp %5 : vector<128x128xi8> to vector<128x128xf32>
    %cst = arith.constant dense<0.000000e+00> : vector<1x128xf32>
    %7 = tpu.matmul %4, %6, %cst {dimension_numbers = #tpu.dot_dimension_numbers<[1], [0], [0], [1], [0, 0, 1, 1], [], []>} : vector<1x128xf32>, vector<128x128xf32>, vector<1x128xf32> -> vector<1x128xf32>
    %8 = arith.addf %3, %7 : vector<1x128xf32>
    %c0_6 = arith.constant 0 : index
    %c0_7 = arith.constant 0 : index
    %9 = vector.load %arg4[%c0_6, %c0_7] : memref<1x128xf32, #tpu.memory_space<vmem>>, vector<1x128xf32>
    tpu.vector_store %arg4[%c0_6, %c0_7], %8 {strides = array<i32>} : memref<1x128xf32, #tpu.memory_space<vmem>>, vector<1x128xf32>,
    return
  }
  func.func @transform_0(%arg0: i32, %arg1: i32) -> (i32, i32) {
    %c0_i32 = arith.constant 0 : i32
    %c0_i32_0 = arith.constant 0 : i32
    return %c0_i32, %arg1 : i32, i32
  }
  func.func @transform_1(%arg0: i32, %arg1: i32) -> (i32, i32) {
    %c0_i32 = arith.constant 0 : i32
    return %arg1, %arg0 : i32, i32
  }
  func.func @transform_2(%arg0: i32, %arg1: i32) -> (i32, i32) {
    %c0_i32 = arith.constant 0 : i32
    %c0_i32_0 = arith.constant 0 : i32
    return %c0_i32, %arg0 : i32, i32
  }
}

</mosaic_0001>

<bundles_post_ra>
// kernel: tpu_custom_call.1
= control target key start
LH: loop header
LB: loop body
LE: loop exit
PB: predicated region body
PF: predicated region fallthrough
CT: control target
= control target key end

     0   :  { %7 = vsyncpa [#allocation3], 0  ;;  %s343_s0 = inlined_call_operand.hbm [shape: f32[1,128], index: 0, kind: input, shape index: {}]   ;;  %s344_s1 = inlined_call_operand.hbm [shape: s8[128,128], index: 1, kind: input, shape index: {}]   ;;  %s345_s2 = inlined_call_operand.hbm [shape: f32[1,128], index: 2, kind: output, shape index: {}]  }
   0x1   :  { %8 = vsyncpa [#allocation6], 0 }
   0x2   :  { %9 = vsyncpa [#allocation4], 0  ;;  %s294_s9 = smov [#allocation2]   ;;  %s295_s11 = smov [#allocation5]  }
   0x3   :  { %s16_s10 = sshll.u32 %s294_s9, 4  ;;  %s25_s12 = sshll.u32 %s295_s11, 4  ;;  %s17_s10 = int_to_ptr.vmem [resolvable:$true] %s16_s10  ;;  %s26_s12 = int_to_ptr.vmem [resolvable:$true] %s25_s12 }
   0x4   :  { %s236_s13 = scalar_lea.vmem %s17_s10, 16  ;;  %s240_s14 = scalar_lea.vmem %s17_s10, 32 }
   0x5   :  { %p237_p0 = scmp.ne.s32.totalorder %s17_s10, %s236_s13  ;;  %p241_p1 = scmp.lt.s32.totalorder %s17_s10, %s17_s10 }
   0x6   :  { %p242_p2 = scmp.lt.s32.totalorder %s240_s14, %s236_s13 }
   0x8   :  { %p243_p3 = por %p242_p2, %p241_p1 }
   0xa   :  { %p244_p4 = pnand %p243_p3, %p237_p0 }
   0xc   :  { %247 = shalt.err (!%p244_p4)
}
   0xd   :  { %19 = dma.hbm_to_vmem [thread:$0]  %s343_s0, 16, %s17_s10, [#allocation3]  }
   0xe   :  { %s256_s17 = scalar_lea.vmem %s26_s12, 512  ;;  %p261_p6 = scmp.lt.s32.totalorder %s26_s12, %s26_s12 }
   0xf   :  { %p257_p5 = scmp.ne.s32.totalorder %s26_s12, %s256_s17  ;;  %p262_p7 = scmp.lt.s32.totalorder %s256_s17, %s256_s17 }
  0x11   :  { %p263_p8 = por %p262_p7, %p261_p6 }
  0x13   :  { %p264_p9 = pnand %p263_p8, %p257_p5 }
  0x15   :  { %267 = shalt.err (!%p264_p9)
}
  0x16   :  { %s296_s18 = smov 128   ;;  %s297_s19 = smov 8  }
  0x17   :  { %31 = dma.hbm_to_vmem [thread:$0]  %s344_s1, 512, %s26_s12, [#allocation6], %s296_s18, %s296_s18, %s297_s19  }
  0x18   :  { %288 = dma.done.wait [#allocation3], 16  }
  0x19   :  { %289 = vsyncadd [#allocation3], 4294967280 }
  0x1a   :  { %290 = dma.done.wait [#allocation6], 512  }
  0x1b   :  { %291 = vsyncadd [#allocation6], 4294966784  ;;  %v298_v0 = vmov 0.0   ;;  %vm299_vm0 = vmmov 0   ;;  %v48_v1 = vld [vmem:[#allocation5 + $0x18] sm:$0xff]  ;;  %v47_v5 = vld [vmem:[#allocation5 + $0x10] sm:$0xff] }
  0x1c   :  { %42 = vst [vmem:[#allocation7] sm:$0x1] %v298_v0  ;;  %186 = vmatprep.subr.mxu0 %v298_v0  ;;  %218 = vmatprep.mubr.msk.f32.mxu0 %vm299_vm0, %v298_v0  ;;  %v64_v2 = vunpack.c.3.s8 %v48_v1  ;;  %v63_v3 = vunpack.c.2.s8 %v48_v1  ;;  %v62_v4 = vunpack.c.1.s8 %v48_v1  ;;  %v61_v8 = vunpack.c.0.s8 %v48_v1  ;;  %v46_v15 = vld [vmem:[#allocation5 + $0x8] sm:$0xff]  ;;  %v45_v24 = vld [vmem:[#allocation5] sm:$0xff]  ;;  %v44_v37 = vld [vmem:[#allocation2] sm:$0x1] }
  0x1d   :  { %v60_v10 = vunpack.c.3.s8 %v47_v5  ;;  %v59_v12 = vunpack.c.2.s8 %v47_v5  ;;  %v58_v14 = vunpack.c.1.s8 %v47_v5  ;;  %v57_v17 = vunpack.c.0.s8 %v47_v5  ;;  %s300_s0 = smov [#allocation7]  }
  0x1e   :  { %v80_v6 = vcvt.s32.f32 %v64_v2  ;;  %v79_v7 = vcvt.s32.f32 %v63_v3  ;;  %v78_v9 = vcvt.s32.f32 %v62_v4  ;;  %v77_v11 = vcvt.s32.f32 %v61_v8  ;;  %s159_s1 = sshll.u32 %s300_s0, 4  ;;  %s160_s1 = int_to_ptr.vmem [resolvable:$true] %s159_s1 }
  0x1f   :  { %v76_v13 = vcvt.s32.f32 %v60_v10  ;;  %v75_v16 = vcvt.s32.f32 %v59_v12  ;;  %v74_v18 = vcvt.s32.f32 %v58_v14  ;;  %v56_v19 = vunpack.c.3.s8 %v46_v15  ;;  %s268_s22 = scalar_lea.vmem %s160_s1, 16  ;;  %s272_s23 = scalar_lea.vmem %s160_s1, 32 }
  0x20   :  { %187 = vmatpush3.msra.mxu0 %v80_v6  ;;  %v73_v20 = vcvt.s32.f32 %v57_v17  ;;  %v55_v21 = vunpack.c.2.s8 %v46_v15  ;;  %v54_v23 = vunpack.c.1.s8 %v46_v15  ;;  %v53_v26 = vunpack.c.0.s8 %v46_v15  ;;  %p269_p10 = scmp.ne.s32.totalorder %s160_s1, %s268_s22  ;;  %p273_p11 = scmp.lt.s32.totalorder %s160_s1, %s160_s1 }
  0x21   :  { %188 = vmatprep.subr.mxu0 %v298_v0  ;;  %v72_v22 = vcvt.s32.f32 %v56_v19  ;;  %v52_v28 = vunpack.c.3.s8 %v45_v24  ;;  %v51_v30 = vunpack.c.2.s8 %v45_v24  ;;  %v50_v32 = vunpack.c.1.s8 %v45_v24  ;;  %p274_p12 = scmp.lt.s32.totalorder %s272_s23, %s268_s22 }
  0x22   :  { %189 = vmatpush3.msra.mxu0 %v79_v7  ;;  %v71_v25 = vcvt.s32.f32 %v55_v21  ;;  %v70_v27 = vcvt.s32.f32 %v54_v23  ;;  %v69_v29 = vcvt.s32.f32 %v53_v26  ;;  %v49_v34 = vunpack.c.0.s8 %v45_v24 }
  0x23   :  { %190 = vmatprep.subr.mxu0 %v298_v0  ;;  %v68_v31 = vcvt.s32.f32 %v52_v28  ;;  %v67_v33 = vcvt.s32.f32 %v51_v30  ;;  %v66_v35 = vcvt.s32.f32 %v50_v32  ;;  %v43_v38 = vld [vmem:[#allocation7] sm:$0x1]  ;;  %p275_p13 = por %p274_p12, %p273_p11 }
  0x24   :  { %191 = vmatpush3.msra.mxu0 %v78_v9  ;;  %v65_v36 = vcvt.s32.f32 %v49_v34 }
  0x25   :  { %192 = vmatprep.subr.mxu0 %v298_v0  ;;  %p276_p0 = pnand %p275_p13, %p269_p10 }
  0x26   :  { %193 = vmatpush3.msra.mxu0 %v77_v11 }
  0x27   :  { %194 = vmatprep.subr.mxu0 %v298_v0 }
  0x28   :  { %195 = vmatpush3.msra.mxu0 %v76_v13 }
  0x29   :  { %196 = vmatprep.subr.mxu0 %v298_v0 }
  0x2a   :  { %197 = vmatpush3.msra.mxu0 %v75_v16 }
  0x2b   :  { %198 = vmatprep.subr.mxu0 %v298_v0 }
  0x2c   :  { %199 = vmatpush3.msra.mxu0 %v74_v18 }
  0x2d   :  { %200 = vmatprep.subr.mxu0 %v298_v0 }
  0x2e   :  { %201 = vmatpush3.msra.mxu0 %v73_v20 }
  0x2f   :  { %202 = vmatprep.subr.mxu0 %v298_v0 }
  0x30   :  { %203 = vmatpush3.msra.mxu0 %v72_v22 }
  0x31   :  { %204 = vmatprep.subr.mxu0 %v298_v0 }
  0x32   :  { %205 = vmatpush3.msra.mxu0 %v71_v25 }
  0x33   :  { %206 = vmatprep.subr.mxu0 %v298_v0 }
  0x34   :  { %207 = vmatpush3.msra.mxu0 %v70_v27 }
  0x35   :  { %208 = vmatprep.subr.mxu0 %v298_v0 }
  0x36   :  { %209 = vmatpush3.msra.mxu0 %v69_v29 }
  0x37   :  { %210 = vmatprep.subr.mxu0 %v298_v0 }
  0x38   :  { %211 = vmatpush3.msra.mxu0 %v68_v31 }
  0x39   :  { %212 = vmatprep.subr.mxu0 %v298_v0 }
  0x3a   :  { %213 = vmatpush3.msra.mxu0 %v67_v33 }
  0x3b   :  { %214 = vmatprep.subr.mxu0 %v298_v0 }
  0x3c   :  { %215 = vmatpush3.msra.mxu0 %v66_v35 }
  0x3d   :  { %216 = vmatprep.subr.mxu0 %v298_v0 }
  0x3e   :  { %217 = vmatpush3.msra.mxu0 %v65_v36 }
  0x3f   :  { %219 = vmatmul.mubr.f32.vlgmr.msra.gmra.mxu0 %v44_v37 }
  0xff   :  { %v147_v39 = vpop.f32.mrf.mxu0 }
 0x100   :  { %v151_v40 = vadd.f32 %v147_v39, %v43_v38 }
 0x101   :  { %v220_v41 = vpop.f32.mrf.mxu0 }
 0x102   :  { %152 = vst [vmem:[#allocation7] sm:$0x1] %v151_v40 }
 0x103   :  { %279 = shalt.err (!%p276_p0)
}
 0x104   :  { %162 = dma.vmem_to_hbm [thread:$0]  %s160_s1, 16, %s345_s2, [#allocation4]  }
 0x105   :  { %292 = dma.done.wait [#allocation4], 16  }
 0x106   :  { %293 = vsyncadd [#allocation4], 4294967280 }
 0x107   :  { %166 = vsyncpa [#allocation3], 1 }
 0x108   :  { %167 = vsyncpa [#allocation6], 1 }
 0x109   :  { %168 = vsyncpa [#allocation4], 1 }

</bundles_post_ra>
